<compile_context>
chip_gen: v7x
topology: tpu7x:2x2x1
jax: 0.10.0
libtpu: 0.0.40
codegen_flags: <defaults>
</compile_context>

<pallas_src>
import functools

import numpy as np
import jax
import jax.numpy as jnp
from jax.experimental import pallas as pl
from jax.experimental.pallas import tpu as pltpu

_LANE = 128       # vreg lane width
_SUBLANE = 8      # f32 sublane count


def _round_up(x, m):
    return -(-x // m) * m


def _row_align(dtype):
    # Second-to-last block-dim alignment: 8 (f32), 16 (bf16), 32 (int8/fp8).
    return max(_SUBLANE, 32 // jnp.dtype(dtype).itemsize)


def _tpu_tuning():
    """Generation-aware tile budget / VMEM limit / TensorCore count."""
    kind = ""
    try:
        dev = jax.devices()[0]
        if dev.platform == "tpu":
            kind = dev.device_kind.lower()
    except Exception:
        pass
    # Dual-TensorCore (megacore) parts where a 'parallel' grid split can help.
    multi_tc = any(t in kind for t in ("v7", "v4", "v5p"))
    if "v7" in kind or not kind:
        # v7x: 64 MiB physical VMEM (32 MiB scoped default) -> stay modest.
        budget, limit = 2 * 1024 * 1024, 32 * 1024 * 1024
    else:
        # v5e / v6e (and v4/v5p): 128 MiB VMEM -> bigger tiles, longer DMAs.
        budget, limit = 4 * 1024 * 1024, 64 * 1024 * 1024
    return budget, limit, multi_tc


_TILE_BUDGET_BYTES, _VMEM_LIMIT_BYTES, _MULTI_TC = _tpu_tuning()


def _choose_tile(num_rows, row_bytes, align, prefer_split):
    """Tile length along the blocked axis.

    - fits _TILE_BUDGET_BYTES of the DMA'd dtype per pipelined buffer,
    - multiple of `align` when the axis is split (partial last block masked),
    - exact full extent when a single tile suffices (no masking at all),
    - optional 2-way split only on dual-TensorCore chips.
    """
    budget_rows = max(align,
                      (_TILE_BUDGET_BYTES // max(row_bytes, 1)) // align * align)
    num_tiles = pl.cdiv(num_rows, budget_rows)
    if prefer_split and num_tiles == 1 and num_rows >= 2 * align:
        num_tiles = 2
    if num_tiles == 1:
        return num_rows
    return _round_up(pl.cdiv(num_rows, num_tiles), align)


@functools.lru_cache(maxsize=None)
def _group_sum_matrix(group):
    """(128,128) block-diagonal ones matrix: dot(x, G) sums lanes per group."""
    lane = np.arange(_LANE)
    blocks = (lane[:, None] // group) == (lane[None, :] // group)
    return jnp.asarray(blocks, dtype=jnp.float32)


# --------------------------------------------------------------------------
# Kernels
# --------------------------------------------------------------------------
def _ln_lastdim_kernel(x_ref, w_ref, b_ref, o_ref, *, eps):
    """LayerNorm over the last (lane) axis of a (rows, C) tile."""
    x = x_ref[...].astype(jnp.float32)                    # (tm, C)
    c = x.shape[-1]
    mean = jnp.sum(x, axis=-1, keepdims=True) * (1.0 / c)
    xc = x - mean
    var = jnp.sum(xc * xc, axis=-1, keepdims=True) * (1.0 / c)
    inv = jax.lax.rsqrt(var + eps)
    w = w_ref[...].astype(jnp.float32)                    # (1, C)
    b = b_ref[...].astype(jnp.float32)                    # (1, C)
    o_ref[...] = ((xc * inv) * w + b).astype(o_ref.dtype)


def _ln_packed_kernel(x_ref, g_ref, w_ref, b_ref, o_ref, *, eps, group):
    """Lane-dense LayerNorm for small C (C divides 128): each (row, 128) slab
    holds 128//group independent rows of `group` channels.  Grouped sums go
    through the otherwise-idle MXU via a constant block-diagonal ones matrix,
    keeping the VPU free and the kernel HBM-bound."""
    x = x_ref[...].astype(jnp.float32)                    # (tm, 128)
    g = g_ref[...]                                        # (128, 128) f32
    inv_g = 1.0 / group
    mean = jnp.dot(x, g, preferred_element_type=jnp.float32) * inv_g
    xc = x - mean
    var = jnp.dot(xc * xc, g, preferred_element_type=jnp.float32) * inv_g
    inv = jax.lax.rsqrt(var + eps)
    w = w_ref[...].astype(jnp.float32)                    # (1, 128) = weight tiled
    b = b_ref[...].astype(jnp.float32)
    o_ref[...] = ((xc * inv) * w + b).astype(o_ref.dtype)


def _ln_nchw_kernel(x_ref, w_ref, b_ref, o_ref, *, eps):
    """LayerNorm over the channel (sublane) axis of a (1, C, tile_hw) tile, so
    NCHW inputs are normalized without any HBM transpose."""
    x = x_ref[...].astype(jnp.float32)                    # (1, C, T)
    c = x.shape[1]
    mean = jnp.sum(x, axis=1, keepdims=True) * (1.0 / c)  # (1, 1, T)
    xc = x - mean
    var = jnp.sum(xc * xc, axis=1, keepdims=True) * (1.0 / c)
    inv = jax.lax.rsqrt(var + eps)
    w = w_ref[...].astype(jnp.float32)                    # (1, C, 1)
    b = b_ref[...].astype(jnp.float32)
    o_ref[...] = ((xc * inv) * w + b).astype(o_ref.dtype)


# --------------------------------------------------------------------------
# Launch helpers
# --------------------------------------------------------------------------
def _rows_call(kernel, x2d, consts, tile_rows):
    """Run a row-tiled kernel: grid = cdiv(rows, tile_rows); the last block is
    masked by Pallas when it is partial.  `consts` are grid-invariant inputs
    (weight / bias / grouped-sum matrix) fetched once (constant index_map)."""
    rows, width = x2d.shape
    grid = (pl.cdiv(rows, tile_rows),)
    in_specs = [pl.BlockSpec((tile_rows, width), lambda i: (i, 0))]
    in_specs += [
        pl.BlockSpec(c.shape, lambda i, n=c.ndim: (0,) * n) for c in consts
    ]
    return pl.pallas_call(
        kernel,
        out_shape=jax.ShapeDtypeStruct((rows, width), x2d.dtype),
        grid_spec=pltpu.PrefetchScalarGridSpec(
            num_scalar_prefetch=0,
            grid=grid,
            in_specs=in_specs,
            out_specs=pl.BlockSpec((tile_rows, width), lambda i: (i, 0)),
        ),
        compiler_params=pltpu.CompilerParams(
            dimension_semantics=("parallel",),
            vmem_limit_bytes=_VMEM_LIMIT_BYTES,
        ),
    )(x2d, *consts)


def _layernorm_lastdim(x2d, weight, bias, eps):
    """x2d: (R, C), normalize over the last axis."""
    rows, C = x2d.shape
    align = _row_align(x2d.dtype)
    itemsize = jnp.dtype(x2d.dtype).itemsize

    if C < _LANE and _LANE % C == 0 and rows % (_LANE // C) == 0:
        # Small C packing: free bitcast reshape -> lane-dense DMA and stores.
        g = _LANE // C
        packed_rows = rows // g
        xp = x2d.reshape(packed_rows, _LANE)              # metadata-only reshape
        tile_rows = _choose_tile(packed_rows, _LANE * itemsize, align, _MULTI_TC)
        w_row = jnp.tile(weight.reshape(1, C), (1, g))
        b_row = jnp.tile(bias.reshape(1, C), (1, g))
        gmat = _group_sum_matrix(C)
        kernel = functools.partial(_ln_packed_kernel, eps=eps, group=C)
        y = _rows_call(kernel, xp, [gmat, w_row, b_row], tile_rows)
        return y.reshape(rows, C)

    # Generic case: C is the lane axis (full extent); row tiles, no padding.
    tile_rows = _choose_tile(rows, C * itemsize, align, _MULTI_TC)
    kernel = functools.partial(_ln_lastdim_kernel, eps=eps)
    return _rows_call(kernel, x2d, [weight.reshape(1, C), bias.reshape(1, C)],
                      tile_rows)


def _layernorm_nchw(x, weight, bias, eps):
    """x: (N, C, H, W), normalize over C without any transpose or padding."""
    N, C, H, W = x.shape
    HW = H * W
    x3 = x.reshape(N, C, HW)                              # metadata-only reshape
    itemsize = jnp.dtype(x.dtype).itemsize
    # Account for sublane padding when C is smaller than the sublane tile.
    padded_c = _round_up(C, _row_align(x.dtype))
    prefer_split = _MULTI_TC and N == 1
    tile_hw = _choose_tile(HW, padded_c * itemsize, _LANE, prefer_split)
    grid = (N, pl.cdiv(HW, tile_hw))
    w3 = weight.reshape(1, C, 1)
    b3 = bias.reshape(1, C, 1)
    kernel = functools.partial(_ln_nchw_kernel, eps=eps)
    y3 = pl.pallas_call(
        kernel,
        out_shape=jax.ShapeDtypeStruct((N, C, HW), x.dtype),
        grid_spec=pltpu.PrefetchScalarGridSpec(
            num_scalar_prefetch=0,
            grid=grid,
            in_specs=[
                pl.BlockSpec((1, C, tile_hw), lambda n, t: (n, 0, t)),
                pl.BlockSpec((1, C, 1), lambda n, t: (0, 0, 0)),
                pl.BlockSpec((1, C, 1), lambda n, t: (0, 0, 0)),
            ],
            out_specs=pl.BlockSpec((1, C, tile_hw), lambda n, t: (n, 0, t)),
        ),
        compiler_params=pltpu.CompilerParams(
            dimension_semantics=("parallel", "parallel"),
            vmem_limit_bytes=_VMEM_LIMIT_BYTES,
        ),
    )(x3, w3, b3)
    return y3.reshape(N, C, H, W)


# --------------------------------------------------------------------------
# Module
# --------------------------------------------------------------------------
class LayerNorm:
    """JAX/Pallas port of the PyTorch LayerNorm module (channels_last /
    channels_first), biased variance, eps inside the sqrt."""

    def __init__(self, normalized_shape, eps=1e-6, data_format="channels_last"):
        if data_format not in ("channels_last", "channels_first"):
            raise NotImplementedError
        self.eps = float(eps)
        self.data_format = data_format
        self.normalized_shape = (normalized_shape,)
        # nn.Parameter(torch.ones/zeros(normalized_shape))
        self.weight = jnp.ones((normalized_shape,), dtype=jnp.float32)
        self.bias = jnp.zeros((normalized_shape,), dtype=jnp.float32)

    def __call__(self, x):
        C = self.normalized_shape[0]
        if self.data_format == "channels_last":
            assert x.shape[-1] == C
            lead = x.shape[:-1]
            y = _layernorm_lastdim(x.reshape(-1, C), self.weight, self.bias,
                                   self.eps)
            return y.reshape(*lead, C)
        else:
            assert x.ndim == 4 and x.shape[1] == C
            # Direct NCHW kernel: no HBM transposes.
            return _layernorm_nchw(x, self.weight, self.bias, self.eps)


# --------------------------------------------------------------------------
# Pure-JAX references + self-test
# --------------------------------------------------------------------------
def _ref_layernorm_last(x, w, b, eps):
    xf = x.astype(jnp.float32)
    m = jnp.mean(xf, axis=-1, keepdims=True)
    v = jnp.mean((xf - m) ** 2, axis=-1, keepdims=True)
    return ((xf - m) / jnp.sqrt(v + eps)) * w + b


def _ref_layernorm_first(x, w, b, eps):
    xf = x.astype(jnp.float32)
    u = jnp.mean(xf, axis=1, keepdims=True)
    s = jnp.mean((xf - u) ** 2, axis=1, keepdims=True)
    xn = (xf - u) / jnp.sqrt(s + eps)
    return w[:, None, None] * xn + b[:, None, None]


def _check(name, y, ref, atol, rtol):
    yf = y.astype(jnp.float32)
    err = float(jnp.max(jnp.abs(yf - ref)))
    assert jnp.allclose(yf, ref, atol=atol, rtol=rtol), f"{name}: max abs err {err}"


if __name__ == "__main__":
    keys = jax.random.split(jax.random.PRNGKey(0), 12)

    # 1) channels_last, small C dividing 128, rows pack evenly -> MXU packed path.
    C1 = 32
    x1 = jax.random.normal(keys[0], (2, 8, 8, C1), dtype=jnp.float32) * 2.0 + 3.0
    ln1 = LayerNorm(C1, eps=1e-6, data_format="channels_last")
    ln1.weight = jax.random.normal(keys[1], (C1,), dtype=jnp.float32)
    ln1.bias = jax.random.normal(keys[2], (C1,), dtype=jnp.float32)
    y1 = jax.block_until_ready(ln1(x1))
    _check("packed_f32", y1, _ref_layernorm_last(x1, ln1.weight, ln1.bias, ln1.eps),
           1e-3, 1e-3)

    # 2) channels_first (NCHW), HW multiple of 128.
    C2 = 4
    x2 = jax.random.normal(keys[3], (2, C2, 16, 16), dtype=jnp.float32) + 1.5
    ln2 = LayerNorm(C2, eps=1e-6, data_format="channels_first")
    ln2.weight = jax.random.normal(keys[4], (C2,), dtype=jnp.float32)
    ln2.bias = jax.random.normal(keys[5], (C2,), dtype=jnp.float32)
    y2 = jax.block_until_ready(ln2(x2))
    _check("nchw", y2, _ref_layernorm_first(x2, ln2.weight, ln2.bias, ln2.eps),
           1e-4, 1e-4)

    # 3) channels_first with HW not a multiple of 128 (full-extent lane block).
    x3 = jax.random.normal(keys[6], (1, 8, 9, 13), dtype=jnp.float32)
    ln3 = LayerNorm(8, eps=1e-6, data_format="channels_first")
    y3 = jax.block_until_ready(ln3(x3))
    _check("nchw_ragged", y3, _ref_layernorm_first(x3, ln3.weight, ln3.bias, ln3.eps),
           1e-4, 1e-4)

    # 4) channels_last generic kernel (C neither divides nor is 128).
    C4 = 192
    x4 = jax.random.normal(keys[7], (2, 5, 3, C4), dtype=jnp.float32) - 2.0
    ln4 = LayerNorm(C4, eps=1e-6, data_format="channels_last")
    ln4.weight = jax.random.normal(keys[8], (C4,), dtype=jnp.float32)
    y4 = jax.block_until_ready(ln4(x4))
    _check("generic", y4, _ref_layernorm_last(x4, ln4.weight, ln4.bias, ln4.eps),
           1e-4, 1e-4)

    # 5) channels_last small C but rows % (128//C) != 0 -> generic fallback.
    x5 = jax.random.normal(keys[9], (1, 5, 5, 32), dtype=jnp.float32)
    ln5 = LayerNorm(32, eps=1e-6, data_format="channels_last")
    y5 = jax.block_until_ready(ln5(x5))
    _check("small_c_fallback", y5,
           _ref_layernorm_last(x5, ln5.weight, ln5.bias, ln5.eps), 1e-4, 1e-4)

    # 6) bf16 input through the packed path (dtype-aware tiling).
    C6 = 64
    x6 = (jax.random.normal(keys[10], (2, 7, 9, C6), dtype=jnp.float32) * 1.5
          + 0.5).astype(jnp.bfloat16)
    ln6 = LayerNorm(C6, eps=1e-6, data_format="channels_last")
    ln6.weight = jax.random.normal(keys[11], (C6,), dtype=jnp.float32)
    y6 = jax.block_until_ready(ln6(x6))
    _check("packed_bf16", y6,
           _ref_layernorm_last(x6, ln6.weight, ln6.bias, ln6.eps), 5e-2, 5e-2)

    print("KERNEL_OK")
</pallas_src>

<mosaic_0001>
module attributes {stable_mosaic.version = 11 : i64} {
  func.func @_ln_packed_kernel(%arg0: i32, %arg1: memref<32x128xf32, #tpu.memory_space<vmem>>, %arg2: memref<128x128xf32, #tpu.memory_space<vmem>>, %arg3: memref<1x128xf32, #tpu.memory_space<vmem>>, %arg4: memref<1x128xf32, #tpu.memory_space<vmem>>, %arg5: memref<32x128xf32, #tpu.memory_space<vmem>>) attributes {dimension_semantics = [#tpu.dimension_semantics<parallel>], iteration_bounds = array<i64: 1>, scalar_prefetch = 0 : i64, scratch_operands = 0 : i64, tpu.core_type = #tpu.core_type<tc>, window_params = [{transform_indices = @transform_0, window_bounds = array<i64: 32, 128>}, {pipeline_mode = #tpu.pipeline_mode<synchronous>, transform_indices = @transform_1, window_bounds = array<i64: 128, 128>}, {pipeline_mode = #tpu.pipeline_mode<synchronous>, transform_indices = @transform_2, window_bounds = array<i64: 1, 128>}, {pipeline_mode = #tpu.pipeline_mode<synchronous>, transform_indices = @transform_3, window_bounds = array<i64: 1, 128>}, {transform_indices = @transform_4, window_bounds = array<i64: 32, 128>}]} {
    %c0 = arith.constant 0 : index
    %c0_0 = arith.constant 0 : index
    %0 = vector.load %arg1[%c0, %c0_0] : memref<32x128xf32, #tpu.memory_space<vmem>>, vector<32x128xf32>
    %c0_1 = arith.constant 0 : index
    %c0_2 = arith.constant 0 : index
    %1 = vector.load %arg2[%c0_1, %c0_2] : memref<128x128xf32, #tpu.memory_space<vmem>>, vector<128x128xf32>
    %cst = arith.constant dense<0.000000e+00> : vector<32x128xf32>
    %2 = tpu.matmul %0, %1, %cst {dimension_numbers = #tpu.dot_dimension_numbers<[1], [0], [0], [1], [0, 0, 1, 1], [], []>} : vector<32x128xf32>, vector<128x128xf32>, vector<32x128xf32> -> vector<32x128xf32>
    %cst_3 = arith.constant 3.125000e-02 : f32
    %3 = vector.broadcast %cst_3 : f32 to vector<32x128xf32>
    %4 = arith.mulf %2, %3 : vector<32x128xf32>
    %5 = arith.subf %0, %4 : vector<32x128xf32>
    %6 = arith.mulf %5, %5 : vector<32x128xf32>
    %cst_4 = arith.constant dense<0.000000e+00> : vector<32x128xf32>
    %7 = tpu.matmul %6, %1, %cst_4 {dimension_numbers = #tpu.dot_dimension_numbers<[1], [0], [0], [1], [0, 0, 1, 1], [], []>} : vector<32x128xf32>, vector<128x128xf32>, vector<32x128xf32> -> vector<32x128xf32>
    %cst_5 = arith.constant 3.125000e-02 : f32
    %8 = vector.broadcast %cst_5 : f32 to vector<32x128xf32>
    %9 = arith.mulf %7, %8 : vector<32x128xf32>
    %cst_6 = arith.constant 9.99999997E-7 : f32
    %10 = vector.broadcast %cst_6 : f32 to vector<32x128xf32>
    %11 = arith.addf %9, %10 : vector<32x128xf32>
    %12 = math.rsqrt %11 : vector<32x128xf32>
    %c0_7 = arith.constant 0 : index
    %c0_8 = arith.constant 0 : index
    %13 = vector.load %arg3[%c0_7, %c0_8] : memref<1x128xf32, #tpu.memory_space<vmem>>, vector<1x128xf32>
    %c0_9 = arith.constant 0 : index
    %c0_10 = arith.constant 0 : index
    %14 = vector.load %arg4[%c0_9, %c0_10] : memref<1x128xf32, #tpu.memory_space<vmem>>, vector<1x128xf32>
    %15 = arith.mulf %5, %12 : vector<32x128xf32>
    %16 = vector.broadcast %13 : vector<1x128xf32> to vector<32x128xf32>
    %17 = arith.mulf %15, %16 : vector<32x128xf32>
    %18 = vector.broadcast %14 : vector<1x128xf32> to vector<32x128xf32>
    %19 = arith.addf %17, %18 : vector<32x128xf32>
    %c0_11 = arith.constant 0 : index
    %c0_12 = arith.constant 0 : index
    %20 = vector.load %arg5[%c0_11, %c0_12] : memref<32x128xf32, #tpu.memory_space<vmem>>, vector<32x128xf32>
    tpu.vector_store %arg5[%c0_11, %c0_12], %19 {strides = array<i32>} : memref<32x128xf32, #tpu.memory_space<vmem>>, vector<32x128xf32>,
    return
  }
  func.func @transform_0(%arg0: i32) -> (i32, i32) {
    %c0_i32 = arith.constant 0 : i32
    %c0_i32_0 = arith.constant 0 : i32
    return %arg0, %c0_i32 : i32, i32
  }
  func.func @transform_1(%arg0: i32) -> (i32, i32) {
    %c0_i32 = arith.constant 0 : i32
    %c0_i32_0 = arith.constant 0 : i32
    %c0_i32_1 = arith.constant 0 : i32
    return %c0_i32, %c0_i32_0 : i32, i32
  }
  func.func @transform_2(%arg0: i32) -> (i32, i32) {
    %c0_i32 = arith.constant 0 : i32
    %c0_i32_0 = arith.constant 0 : i32
    %c0_i32_1 = arith.constant 0 : i32
    return %c0_i32, %c0_i32_0 : i32, i32
  }
  func.func @transform_3(%arg0: i32) -> (i32, i32) {
    %c0_i32 = arith.constant 0 : i32
    %c0_i32_0 = arith.constant 0 : i32
    %c0_i32_1 = arith.constant 0 : i32
    return %c0_i32, %c0_i32_0 : i32, i32
  }
  func.func @transform_4(%arg0: i32) -> (i32, i32) {
    %c0_i32 = arith.constant 0 : i32
    %c0_i32_0 = arith.constant 0 : i32
    return %arg0, %c0_i32 : i32, i32
  }
}

</mosaic_0001>

<bundles_post_ra>
// kernel: tpu_custom_call.1
= control target key start
LH: loop header
LB: loop body
LE: loop exit
PB: predicated region body
PF: predicated region fallthrough
CT: control target
= control target key end

     0   :  { %9 = vsyncpa [#allocation3], 0  ;;  %s656_s0 = inlined_call_operand.hbm [shape: f32[32,128], index: 0, kind: input, shape index: {}]   ;;  %s657_s1 = inlined_call_operand.hbm [shape: f32[128,128], index: 1, kind: input, shape index: {}]   ;;  %s658_s2 = inlined_call_operand.vmem [shape: f32[1,128], index: 2, kind: input, shape index: {}]   ;;  %s659_s3 = inlined_call_operand.vmem [shape: f32[1,128], index: 3, kind: input, shape index: {}]   ;;  %s660_s4 = inlined_call_operand.hbm [shape: f32[32,128], index: 4, kind: output, shape index: {}]  }
   0x1   :  { %10 = vsyncpa [#allocation6], 0 }
   0x2   :  { %11 = vsyncpa [#allocation4], 0  ;;  %s575_s15 = smov [#allocation2]   ;;  %s503_s19 = scalar_lea.hbm %s656_s0, 512 }
   0x3   :  { %s17_s16 = sshll.u32 %s575_s15, 4  ;;  %p504_p0 = scmp.ne.s32.totalorder %s656_s0, %s503_s19  ;;  %s18_s16 = int_to_ptr.vmem [resolvable:$true] %s17_s16 }
   0x4   :  { %p507_p1 = scmp.lt.u32.totalorder %s503_s19, %s656_s0 }
   0x6   :  { %p509_p2 = pnand %p507_p1, %p504_p0 }
   0x8   :  { %512 = shalt.err (!%p509_p2)
}
   0x9   :  { %s513_s24 = scalar_lea.vmem %s18_s16, 512  ;;  %p518_p4 = scmp.lt.s32.totalorder %s18_s16, %s18_s16 }
   0xa   :  { %p514_p3 = scmp.ne.s32.totalorder %s18_s16, %s513_s24  ;;  %p519_p5 = scmp.lt.s32.totalorder %s513_s24, %s513_s24 }
   0xc   :  { %p520_p6 = por %p519_p5, %p518_p4 }
   0xe   :  { %p521_p7 = pnand %p520_p6, %p514_p3 }
  0x10   :  { %524 = shalt.err (!%p521_p7)
}
  0x11   :  { %s576_s25 = smov 128   ;;  %s577_s26 = smov 8  }
  0x12   :  { %23 = dma.hbm_to_vmem [thread:$0]  %s656_s0, 512, %s18_s16, [#allocation3], %s576_s25, %s576_s25, %s577_s26  }
  0x13   :  { %s578_s29 = smov [#allocation5]   ;;  %s525_s7 = scalar_lea.hbm %s657_s1, 2048 }
  0x14   :  { %s29_s30 = sshll.u32 %s578_s29, 4  ;;  %p526_p8 = scmp.ne.s32.totalorder %s657_s1, %s525_s7  ;;  %s30_s30 = int_to_ptr.vmem [resolvable:$true] %s29_s30 }
  0x15   :  { %p529_p9 = scmp.lt.u32.totalorder %s525_s7, %s657_s1 }
  0x17   :  { %p531_p10 = pnand %p529_p9, %p526_p8 }
  0x19   :  { %534 = shalt.err (!%p531_p10)
}
  0x1a   :  { %s535_s12 = scalar_lea.vmem %s30_s30, 2048  ;;  %p540_p12 = scmp.lt.s32.totalorder %s30_s30, %s30_s30 }
  0x1b   :  { %p536_p11 = scmp.ne.s32.totalorder %s30_s30, %s535_s12  ;;  %p541_p13 = scmp.lt.s32.totalorder %s535_s12, %s535_s12 }
  0x1d   :  { %p542_p0 = por %p541_p13, %p540_p12 }
  0x1f   :  { %p543_p1 = pnand %p542_p0, %p536_p11 }
  0x21   :  { %546 = shalt.err (!%p543_p1)
}
  0x22   :  { %35 = dma.hbm_to_vmem [thread:$0]  %s657_s1, 2048, %s30_s30, [#allocation6], %s576_s25, %s576_s25, %s577_s26  }
  0x23   :  { %569 = dma.done.wait [#allocation3], 512  }
  0x24   :  { %570 = vsyncadd [#allocation3], 4294966784 }
  0x25   :  { %571 = dma.done.wait [#allocation6], 2048  }
  0x26   :  { %572 = vsyncadd [#allocation6], 4294965248  ;;  %v50_v0 = vld [vmem:[#allocation5] sm:$0xff]  ;;  %v51_v1 = vld [vmem:[#allocation5 + $0x8] sm:$0xff]  ;;  %s579_s17 = smov [#allocation7]  }
  0x27   :  { %v52_v2 = vld [vmem:[#allocation5 + $0x10] sm:$0xff]  ;;  %v426_v3 = vpack.c.bf16 %v51_v1, %v50_v0  ;;  %v53_v4 = vld [vmem:[#allocation5 + $0x18] sm:$0xff]  ;;  %v54_v6 = vld [vmem:[#allocation5 + $0x20] sm:$0xff]  ;;  %s295_s18 = sshll.u32 %s579_s17, 4  ;;  %s296_s18 = int_to_ptr.vmem [resolvable:$true] %s295_s18 }
  0x28   :  { %v430_v5 = vpack.c.bf16 %v53_v4, %v52_v2  ;;  %v55_v7 = vld [vmem:[#allocation5 + $0x28] sm:$0xff]  ;;  %v46_v9 = vld [vmem:[#allocation2] sm:$0xff]  ;;  %v56_v10 = vld [vmem:[#allocation5 + $0x30] sm:$0xff]  ;;  %p552_p3 = scmp.lt.s32.totalorder %s296_s18, %s296_s18 }
  0x29   :  { %427 = vmatprep.subr.bf16.mxu0 %v426_v3  ;;  %459 = vmatprep.subr.bf16.mxu1 %v426_v3  ;;  %v434_v8 = vpack.c.bf16 %v55_v7, %v54_v6  ;;  %v57_v11 = vld [vmem:[#allocation5 + $0x38] sm:$0xff]  ;;  %v58_v13 = vld [vmem:[#allocation5 + $0x40] sm:$0xff]  ;;  %v59_v14 = vld [vmem:[#allocation5 + $0x48] sm:$0xff] }
  0x2a   :  { %429 = vmatpush3.bf16.msra.mxu0 %v426_v3  ;;  %461 = vmatpush3.bf16.msra.mxu1 %v426_v3  ;;  %v438_v12 = vpack.c.bf16 %v57_v11, %v56_v10  ;;  %v442_v15 = vpack.c.bf16 %v59_v14, %v58_v13  ;;  %v60_v16 = vld [vmem:[#allocation5 + $0x50] sm:$0xff]  ;;  %v61_v17 = vld [vmem:[#allocation5 + $0x58] sm:$0xff]  ;;  %v62_v19 = vld [vmem:[#allocation5 + $0x60] sm:$0xff] }
  0x2b   :  { %431 = vmatprep.subr.bf16.mxu0 %v430_v5  ;;  %463 = vmatprep.subr.bf16.mxu1 %v430_v5  ;;  %v446_v18 = vpack.c.bf16 %v61_v17, %v60_v16  ;;  %v63_v20 = vld [vmem:[#allocation5 + $0x68] sm:$0xff]  ;;  %v64_v22 = vld [vmem:[#allocation5 + $0x70] sm:$0xff]  ;;  %v65_v23 = vld [vmem:[#allocation5 + $0x78] sm:$0xff] }
  0x2c   :  { %382 = vmatprep.mubr.f32.mxu0 %v46_v9  ;;  %v450_v21 = vpack.c.bf16 %v63_v20, %v62_v19  ;;  %v454_v24 = vpack.c.bf16 %v65_v23, %v64_v22  ;;  %v47_v25 = vld [vmem:[#allocation2 + $0x8] sm:$0xff]  ;;  %v48_v26 = vld [vmem:[#allocation2 + $0x10] sm:$0xff]  ;;  %v49_v27 = vld [vmem:[#allocation2 + $0x18] sm:$0xff] }
  0x2d   :  { %v308_v57 = vld [vmem:[%s658_s2] ss:$0 sm:$0xff]  ;;  %s547_s2 = scalar_lea.vmem %s296_s18, 512 }
  0x2e   :  { %433 = vmatpush3.bf16.msra.mxu0 %v430_v5  ;;  %465 = vmatpush3.bf16.msra.mxu1 %v430_v5  ;;  %v309_v61 = vld [vmem:[%s659_s3] ss:$0 sm:$0xff]  ;;  %p548_p2 = scmp.ne.s32.totalorder %s296_s18, %s547_s2  ;;  %p553_p4 = scmp.lt.s32.totalorder %s547_s2, %s547_s2 }
  0x2f   :  { %435 = vmatprep.subr.bf16.mxu0 %v434_v8  ;;  %467 = vmatprep.subr.bf16.mxu1 %v434_v8 }
  0x30   :  { %p554_p5 = por %p553_p4, %p552_p3 }
  0x32   :  { %437 = vmatpush3.bf16.msra.mxu0 %v434_v8  ;;  %469 = vmatpush3.bf16.msra.mxu1 %v434_v8  ;;  %p555_p6 = pnand %p554_p5, %p548_p2 }
  0x33   :  { %439 = vmatprep.subr.bf16.mxu0 %v438_v12  ;;  %471 = vmatprep.subr.bf16.mxu1 %v438_v12 }
  0x36   :  { %441 = vmatpush3.bf16.msra.mxu0 %v438_v12  ;;  %473 = vmatpush3.bf16.msra.mxu1 %v438_v12 }
  0x37   :  { %443 = vmatprep.subr.bf16.mxu0 %v442_v15  ;;  %475 = vmatprep.subr.bf16.mxu1 %v442_v15 }
  0x3a   :  { %445 = vmatpush3.bf16.msra.mxu0 %v442_v15  ;;  %477 = vmatpush3.bf16.msra.mxu1 %v442_v15 }
  0x3b   :  { %447 = vmatprep.subr.bf16.mxu0 %v446_v18  ;;  %479 = vmatprep.subr.bf16.mxu1 %v446_v18 }
  0x3e   :  { %449 = vmatpush3.bf16.msra.mxu0 %v446_v18  ;;  %481 = vmatpush3.bf16.msra.mxu1 %v446_v18 }
  0x3f   :  { %451 = vmatprep.subr.bf16.mxu0 %v450_v21  ;;  %483 = vmatprep.subr.bf16.mxu1 %v450_v21 }
  0x42   :  { %453 = vmatpush3.bf16.msra.mxu0 %v450_v21  ;;  %485 = vmatpush3.bf16.msra.mxu1 %v450_v21 }
  0x43   :  { %455 = vmatprep.subr.bf16.mxu0 %v454_v24  ;;  %487 = vmatprep.subr.bf16.mxu1 %v454_v24 }
  0x46   :  { %457 = vmatpush3.bf16.msra.mxu0 %v454_v24  ;;  %489 = vmatpush3.bf16.msra.mxu1 %v454_v24 }
  0x49   :  { %383 = vmatmul.mubr.f32.vlgmr.msra.gmra.mrb[0].mxu0 %v47_v25 }
  0x4a   :  { %385 = vmatprep.mubr.f32.mxu0 %v48_v26 }
  0x4d   :  { %386 = vmatmul.mubr.f32.gmra.mrb[2].mxu0 %v49_v27 }
 0x11c   :  { %v384_v28 = vpop.f32.mrb[0].mxu0 }
 0x11d   :  { %v152_v29 = vmul.f32 0.03125, %v384_v28  ;;  %v132_v30 = vpop.f32.mrb[1].mxu0 }
 0x11e   :  { %v151_v31 = vmul.f32 0.03125, %v132_v30 }
 0x11f   :  { %v156_v32 = vsub.f32 %v47_v25, %v152_v29 }
 0x120   :  { %v387_v33 = vpop.f32.mrb[2].mxu0  ;;  %v155_v34 = vsub.f32 %v46_v9, %v151_v31 }
 0x121   :  { %v154_v35 = vmul.f32 0.03125, %v387_v33  ;;  %v142_v36 = vpop.f32.mrb[3].mxu0  ;;  %v160_v40 = vmul.f32 %v156_v32, %v156_v32 }
 0x122   :  { %v153_v37 = vmul.f32 0.03125, %v142_v36  ;;  %v159_v38 = vmul.f32 %v155_v34, %v155_v34 }
 0x123   :  { %v158_v39 = vsub.f32 %v49_v27, %v154_v35 }
 0x124   :  { %v157_v41 = vsub.f32 %v48_v26, %v153_v37  ;;  %420 = vmatprep.mubr.f32.mxu1 %v159_v38 }
 0x125   :  { %421 = vmatmul.mubr.f32.vlgmr.msra.gmra.mrb[0].mxu1 %v160_v40  ;;  %v162_v43 = vmul.f32 %v158_v39, %v158_v39 }
 0x126   :  { %v161_v42 = vmul.f32 %v157_v41, %v157_v41 }
 0x128   :  { %423 = vmatprep.mubr.f32.mxu1 %v161_v42 }
 0x129   :  { %424 = vmatmul.mubr.f32.gmra.mrb[2].mxu1 %v162_v43 }
 0x1f8   :  { %v422_v44 = vpop.f32.mrb[0].mxu1 }
 0x1f9   :  { %v249_v45 = vmul.f32 0.03125, %v422_v44  ;;  %v229_v46 = vpop.f32.mrb[1].mxu1 }
 0x1fa   :  { %v248_v47 = vmul.f32 0.03125, %v229_v46 }
 0x1fb   :  { %v253_v48 = vadd.f32 1e-06, %v249_v45 }
 0x1fc   :  { %v252_v49 = vadd.f32 1e-06, %v248_v47  ;;  %v425_v50 = vpop.f32.mrb[2].mxu1 }
 0x1fd   :  { %495 = vrsqrt.f32 %v253_v48  ;;  %v251_v51 = vmul.f32 0.03125, %v425_v50  ;;  %v239_v52 = vpop.f32.mrb[3].mxu1 }
 0x1fe   :  { %497 = vrsqrt.f32 %v252_v49  ;;  %v250_v53 = vmul.f32 0.03125, %v239_v52 }
 0x1ff   :  { %v255_v54 = vadd.f32 1e-06, %v251_v51 }
 0x200   :  { %v254_v55 = vadd.f32 1e-06, %v250_v53 }
 0x201   :  { %499 = vrsqrt.f32 %v255_v54 }
 0x202   :  { %501 = vrsqrt.f32 %v254_v55 }
 0x207   :  { %v496_v56 = vpop.eup %495 }
 0x208   :  { %v498_v58 = vpop.eup %497  ;;  %v263_v59 = vmul.f32 %v496_v56, %v156_v32 }
 0x209   :  { %v262_v60 = vmul.f32 %v498_v58, %v155_v34 }
 0x20a   :  { %v273_v62 = vmul.f32 %v308_v57, %v263_v59 }
 0x20b   :  { %v500_v63 = vpop.eup %499  ;;  %v272_v0 = vmul.f32 %v308_v57, %v262_v60 }
 0x20c   :  { %v502_v1 = vpop.eup %501  ;;  %v265_v2 = vmul.f32 %v500_v63, %v158_v39  ;;  %v283_v3 = vadd.f32 %v309_v61, %v273_v62 }
 0x20d   :  { %v264_v4 = vmul.f32 %v502_v1, %v157_v41  ;;  %v282_v5 = vadd.f32 %v309_v61, %v272_v0 }
 0x20e   :  { %v275_v6 = vmul.f32 %v308_v57, %v265_v2  ;;  %287 = vst [vmem:[#allocation7 + $0x8] sm:$0xff] %v283_v3 }
 0x20f   :  { %v274_v7 = vmul.f32 %v308_v57, %v264_v4  ;;  %286 = vst [vmem:[#allocation7] sm:$0xff] %v282_v5 }
 0x210   :  { %v285_v8 = vadd.f32 %v309_v61, %v275_v6 }
 0x211   :  { %v284_v9 = vadd.f32 %v309_v61, %v274_v7 }
 0x212   :  { %289 = vst [vmem:[#allocation7 + $0x18] sm:$0xff] %v285_v8 }
 0x213   :  { %288 = vst [vmem:[#allocation7 + $0x10] sm:$0xff] %v284_v9 }
 0x214   :  { %558 = shalt.err (!%p555_p6)
}
 0x215   :  { %s559_s20 = scalar_lea.hbm %s660_s4, 512 }
 0x216   :  { %p560_p7 = scmp.ne.s32.totalorder %s660_s4, %s559_s20  ;;  %p563_p8 = scmp.lt.u32.totalorder %s559_s20, %s660_s4 }
 0x218   :  { %p565_p9 = pnand %p563_p8, %p560_p7 }
 0x21a   :  { %568 = shalt.err (!%p565_p9)
}
 0x21b   :  { %301 = dma.vmem_to_hbm [thread:$0]  %s296_s18, 512, %s660_s4, [#allocation4], %s576_s25, %s576_s25, %s577_s26  }
 0x21c   :  { %573 = dma.done.wait [#allocation4], 512  }
 0x21d   :  { %574 = vsyncadd [#allocation4], 4294966784 }
 0x21e   :  { %305 = vsyncpa [#allocation3], 1 }
 0x21f   :  { %306 = vsyncpa [#allocation6], 1 }
 0x220   :  { %307 = vsyncpa [#allocation4], 1 }

</bundles_post_ra>
